<compile_context>
chip_gen: v7x
topology: tpu7x:2x2x1
jax: 0.10.0
libtpu: 0.0.40
codegen_flags: <defaults>
</compile_context>

<pallas_src>
import functools

import numpy as np
import jax
import jax.numpy as jnp
from jax.experimental import pallas as pl
from jax.experimental.pallas import tpu as pltpu


# ----------------------------------------------------------------------------
# Deterministic parameter construction (mirrors STFT.__init__ / MelSpectrogram.__init__)
# ----------------------------------------------------------------------------
def _hann_window(win_length):
    # scipy.signal.get_window('hann', win_length, fftbins=True)
    n = np.arange(win_length)
    return 0.5 - 0.5 * np.cos(2.0 * np.pi * n / win_length)


def _pad_center(window, size):
    n = len(window)
    lpad = (size - n) // 2
    out = np.zeros(size, dtype=np.float64)
    out[lpad:lpad + n] = window
    return out


def _hz_to_mel_htk(f):
    return 2595.0 * np.log10(1.0 + np.asarray(f, dtype=np.float64) / 700.0)


def _mel_to_hz_htk(m):
    return 700.0 * (10.0 ** (np.asarray(m, dtype=np.float64) / 2595.0) - 1.0)


def _mel_filterbank(sr, n_fft, n_mels, fmin=0.0, fmax=None):
    # librosa.filters.mel(..., htk=True, norm='slaney') re-implemented in numpy.
    if fmax is None:
        fmax = float(sr) / 2.0
    n_freq = 1 + n_fft // 2
    fftfreqs = np.linspace(0.0, float(sr) / 2.0, n_freq)
    mel_pts = np.linspace(_hz_to_mel_htk(fmin), _hz_to_mel_htk(fmax), n_mels + 2)
    mel_f = _mel_to_hz_htk(mel_pts)
    fdiff = np.diff(mel_f)
    ramps = mel_f[:, None] - fftfreqs[None, :]

    weights = np.zeros((n_mels, n_freq), dtype=np.float64)
    for i in range(n_mels):
        lower = -ramps[i] / fdiff[i]
        upper = ramps[i + 2] / fdiff[i + 1]
        weights[i] = np.maximum(0.0, np.minimum(lower, upper))

    enorm = 2.0 / (mel_f[2:n_mels + 2] - mel_f[:n_mels])   # slaney norm
    weights *= enorm[:, None]
    return weights.astype(np.float32)


def _stft_forward_basis(filter_length, win_length):
    # np.fft.fft(np.eye(filter_length)), split into real/imag halves, windowed.
    fourier_basis = np.fft.fft(np.eye(filter_length))
    cutoff = filter_length // 2 + 1
    basis = np.vstack([np.real(fourier_basis[:cutoff, :]),
                       np.imag(fourier_basis[:cutoff, :])])
    window = _pad_center(_hann_window(win_length), filter_length)
    basis = basis * window[None, :]
    real_basis = basis[:cutoff].astype(np.float32)   # (cutoff, filter_length)
    imag_basis = basis[cutoff:].astype(np.float32)   # (cutoff, filter_length)
    return real_basis, imag_basis


def _round_up(x, m):
    return ((x + m - 1) // m) * m


# ----------------------------------------------------------------------------
# Pallas kernel: per (batch, frame-tile) STFT + magnitude + mel + log-clamp
# ----------------------------------------------------------------------------
def _mel_kernel(main_ref, halo_ref, basis_t_ref, mel_t_ref, out_ref, *, num_hops):
    cdt = basis_t_ref.dtype
    main = main_ref[...].astype(cdt)      # (TN, hop)  blocks of this tile
    halo = halo_ref[...].astype(cdt)      # (TN, hop)  next tile's blocks (halo)
    tn = main.shape[0]

    # Rebuild overlapping STFT frames from hop-sized blocks:
    # frames_t[j, r*hop:(r+1)*hop] = block (tile_start + j + r).
    full = jnp.concatenate([main, halo], axis=0)                       # (2*TN, hop)
    frames_t = jnp.concatenate(
        [full[r:r + tn, :] for r in range(num_hops)], axis=1)          # (TN, fl)

    # Fused real+imag STFT matmul: one MXU pass, f32 accumulation.
    stft_t = jnp.dot(frames_t, basis_t_ref[...],
                     preferred_element_type=jnp.float32)               # (TN, 2*CP)
    cp = stft_t.shape[1] // 2
    real_t = stft_t[:, :cp]
    imag_t = stft_t[:, cp:]
    mag_t = jnp.sqrt(real_t * real_t + imag_t * imag_t)                # (TN, CP) f32

    # Mel projection (padded magnitude lanes hit zero mel rows) + log clamp.
    mel_t = jnp.dot(mag_t.astype(cdt), mel_t_ref[...],
                    preferred_element_type=jnp.float32)                # (TN, n_mels_pad)
    out_ref[...] = jnp.log(jnp.maximum(mel_t, 1e-5))


def mel_spectrogram(y, real_basis, imag_basis, mel_basis, filter_length, hop_length,
                    *, frame_tile=256, compute_dtype=jnp.bfloat16):
    """y: (B, T) f32 in [-1, 1]  ->  (B, n_mels, n_frames) f32 (PyTorch layout)."""
    B, T = y.shape
    cutoff, fl = real_basis.shape
    n_mels = mel_basis.shape[0]
    assert fl == filter_length
    if filter_length % hop_length != 0:
        # TODO(synk): general filter_length % hop_length != 0 framing (needs a
        # partial trailing hop block); not needed for onsets_and_frames configs.
        raise NotImplementedError("filter_length must be a multiple of hop_length")
    hop = hop_length
    num_hops = filter_length // hop

    # Reflect pad (matches F.pad(..., mode='reflect')).
    pad = filter_length // 2
    y_pad = jnp.pad(y, ((0, 0), (pad, pad)), mode="reflect")           # (B, T + fl)
    n_frames = T // hop + 1

    # Tile / padding geometry — everything (8, 128)-aligned.
    tile_n = min(_round_up(frame_tile, 8), _round_up(n_frames, 8))
    tile_n = max(tile_n, _round_up(num_hops, 8), 8)
    n_tiles = pl.cdiv(n_frames, tile_n)
    n_frames_pad = n_tiles * tile_n
    cp = _round_up(cutoff, 128)           # padded cutoff (lane dim of magnitude)
    n_mels_pad = _round_up(n_mels, 128)   # padded output lane dim

    # Waveform as hop-sized blocks, plus one extra tile of zero blocks so the
    # halo read of the last tile stays in bounds.  This is a reshape of the
    # padded audio — no duplicated frames array, no gather in HBM.
    total_blocks = (n_tiles + 1) * tile_n
    y_ext = jnp.pad(y_pad, ((0, 0), (0, total_blocks * hop - y_pad.shape[1])))
    y_blocks = y_ext.reshape(B, total_blocks, hop)

    # Stacked, zero-padded, transposed Fourier basis: columns [0, cutoff) hold
    # the real basis, columns [cp, cp + cutoff) the imaginary basis.
    basis_t = jnp.zeros((fl, 2 * cp), jnp.float32)
    basis_t = basis_t.at[:, :cutoff].set(jnp.asarray(real_basis, jnp.float32).T)
    basis_t = basis_t.at[:, cp:cp + cutoff].set(jnp.asarray(imag_basis, jnp.float32).T)
    basis_t = basis_t.astype(compute_dtype)

    # Zero-padded transposed mel filterbank (padded magnitude lanes -> zero rows).
    mel_t = jnp.zeros((cp, n_mels_pad), jnp.float32)
    mel_t = mel_t.at[:cutoff, :n_mels].set(jnp.asarray(mel_basis, jnp.float32).T)
    mel_t = mel_t.astype(compute_dtype)

    kernel = functools.partial(_mel_kernel, num_hops=num_hops)
    out = pl.pallas_call(
        kernel,
        out_shape=jax.ShapeDtypeStruct((B, n_frames_pad, n_mels_pad), jnp.float32),
        grid_spec=pltpu.PrefetchScalarGridSpec(
            num_scalar_prefetch=0,
            grid=(B, n_tiles),
            in_specs=[
                # blocks of this frame tile
                pl.BlockSpec((None, tile_n, hop), lambda b, t: (b, t, 0)),
                # halo: next tile's blocks (only the first num_hops-1 rows used)
                pl.BlockSpec((None, tile_n, hop), lambda b, t: (b, t + 1, 0)),
                # grid-invariant bases
                pl.BlockSpec((fl, 2 * cp), lambda b, t: (0, 0)),
                pl.BlockSpec((cp, n_mels_pad), lambda b, t: (0, 0)),
            ],
            out_specs=pl.BlockSpec((None, tile_n, n_mels_pad),
                                   lambda b, t: (b, t, 0)),
        ),
        compiler_params=pltpu.CompilerParams(
            dimension_semantics=("parallel", "parallel"),
            vmem_limit_bytes=48 * 1024 * 1024,
        ),
    )(y_blocks, y_blocks, basis_t, mel_t)

    # Crop padding and return the PyTorch layout (B, n_mels, n_frames).
    return jnp.transpose(out[:, :n_frames, :n_mels], (0, 2, 1))


# ----------------------------------------------------------------------------
# Pure-JAX reference (for the f32-path sanity check)
# ----------------------------------------------------------------------------
def _mel_reference(y, real_basis, imag_basis, mel_basis, filter_length, hop_length):
    B, T = y.shape
    pad = filter_length // 2
    y_pad = jnp.pad(y, ((0, 0), (pad, pad)), mode="reflect")
    n_frames = T // hop_length + 1
    idx = (np.arange(filter_length)[:, None]
           + hop_length * np.arange(n_frames)[None, :])
    frames = y_pad[:, idx]                                    # (B, fl, n_frames)
    real = jnp.einsum("cf,bfn->bcn", real_basis, frames)
    imag = jnp.einsum("cf,bfn->bcn", imag_basis, frames)
    mag = jnp.sqrt(real * real + imag * imag)
    mel_out = jnp.einsum("mc,bcn->bmn", mel_basis, mag)
    return jnp.log(jnp.maximum(mel_out, 1e-5))


# ----------------------------------------------------------------------------
# Demo / smoke test
# ----------------------------------------------------------------------------
if __name__ == "__main__":
    n_mels = 16
    sample_rate = 1600
    filter_length = 64
    hop_length = 16
    win_length = filter_length
    B, T = 2, 256

    real_basis_np, imag_basis_np = _stft_forward_basis(filter_length, win_length)
    mel_basis_np = _mel_filterbank(sample_rate, filter_length, n_mels,
                                   fmin=0.0, fmax=None)

    key = jax.random.PRNGKey(0)
    y = jax.random.uniform(key, (B, T), dtype=jnp.float32, minval=-1.0, maxval=1.0)

    real_basis = jnp.asarray(real_basis_np)
    imag_basis = jnp.asarray(imag_basis_np)
    mel_basis = jnp.asarray(mel_basis_np)

    n_frames = T // hop_length + 1

    # Performance default: bf16 matmul operands, f32 accumulation / log.
    out_bf16 = mel_spectrogram(y, real_basis, imag_basis, mel_basis,
                               filter_length, hop_length)
    out_bf16 = jax.block_until_ready(out_bf16)
    assert out_bf16.shape == (B, n_mels, n_frames), out_bf16.shape
    assert out_bf16.dtype == jnp.float32

    # f32 path checked against a pure-JAX reference.
    out_f32 = mel_spectrogram(y, real_basis, imag_basis, mel_basis,
                              filter_length, hop_length,
                              compute_dtype=jnp.float32)
    out_f32 = jax.block_until_ready(out_f32)
    ref = jax.block_until_ready(
        _mel_reference(y, real_basis, imag_basis, mel_basis,
                       filter_length, hop_length))
    max_err = float(jnp.max(jnp.abs(out_f32 - ref)))
    assert max_err < 1e-2, max_err

    print("KERNEL_OK")
</pallas_src>

<mosaic_0001>
module attributes {stable_mosaic.version = 11 : i64} {
  func.func @_mel_kernel(%arg0: i32, %arg1: i32, %arg2: memref<1x24x16xf32, #tpu.memory_space<vmem>>, %arg3: memref<1x24x16xf32, #tpu.memory_space<vmem>>, %arg4: memref<64x256xbf16, #tpu.memory_space<vmem>>, %arg5: memref<128x128xbf16, #tpu.memory_space<vmem>>, %arg6: memref<1x24x128xf32, #tpu.memory_space<vmem>>) attributes {dimension_semantics = [#tpu.dimension_semantics<parallel>, #tpu.dimension_semantics<parallel>], iteration_bounds = array<i64: 2, 1>, scalar_prefetch = 0 : i64, scratch_operands = 0 : i64, tpu.core_type = #tpu.core_type<tc>, window_params = [{transform_indices = @transform_0, window_bounds = array<i64: 1, 24, 16>}, {transform_indices = @transform_1, window_bounds = array<i64: 1, 24, 16>}, {pipeline_mode = #tpu.pipeline_mode<synchronous>, transform_indices = @transform_2, window_bounds = array<i64: 64, 256>}, {pipeline_mode = #tpu.pipeline_mode<synchronous>, transform_indices = @transform_3, window_bounds = array<i64: 128, 128>}, {transform_indices = @transform_4, window_bounds = array<i64: 1, 24, 128>}]} {
    %c0 = arith.constant 0 : index
    %c0_0 = arith.constant 0 : index
    %c0_1 = arith.constant 0 : index
    %0 = vector.load %arg2[%c0, %c0_0, %c0_1] : memref<1x24x16xf32, #tpu.memory_space<vmem>>, vector<1x24x16xf32>
    %1 = vector.shape_cast %0 : vector<1x24x16xf32> to vector<24x16xf32>
    %2 = arith.truncf %1 : vector<24x16xf32> to vector<24x16xbf16>
    %c0_2 = arith.constant 0 : index
    %c0_3 = arith.constant 0 : index
    %c0_4 = arith.constant 0 : index
    %3 = vector.load %arg3[%c0_2, %c0_3, %c0_4] : memref<1x24x16xf32, #tpu.memory_space<vmem>>, vector<1x24x16xf32>
    %4 = vector.shape_cast %3 : vector<1x24x16xf32> to vector<24x16xf32>
    %5 = arith.truncf %4 : vector<24x16xf32> to vector<24x16xbf16>
    %6 = tpu.concatenate %2, %5 in 0 : vector<24x16xbf16>, vector<24x16xbf16> -> vector<48x16xbf16>
    %7 = vector.extract_strided_slice %6 {offsets = [0, 0], sizes = [24, 16], strides = [1, 1]} : vector<48x16xbf16> to vector<24x16xbf16>
    %8 = vector.extract_strided_slice %6 {offsets = [1, 0], sizes = [24, 16], strides = [1, 1]} : vector<48x16xbf16> to vector<24x16xbf16>
    %9 = vector.extract_strided_slice %6 {offsets = [2, 0], sizes = [24, 16], strides = [1, 1]} : vector<48x16xbf16> to vector<24x16xbf16>
    %10 = vector.extract_strided_slice %6 {offsets = [3, 0], sizes = [24, 16], strides = [1, 1]} : vector<48x16xbf16> to vector<24x16xbf16>
    %11 = tpu.concatenate %7, %8, %9, %10 in 1 : vector<24x16xbf16>, vector<24x16xbf16>, vector<24x16xbf16>, vector<24x16xbf16> -> vector<24x64xbf16>
    %c0_5 = arith.constant 0 : index
    %c0_6 = arith.constant 0 : index
    %12 = vector.load %arg4[%c0_5, %c0_6] : memref<64x256xbf16, #tpu.memory_space<vmem>>, vector<64x256xbf16>
    %cst = arith.constant dense<0.000000e+00> : vector<24x256xf32>
    %13 = tpu.matmul %11, %12, %cst {dimension_numbers = #tpu.dot_dimension_numbers<[1], [0], [0], [1], [0, 0, 1, 1], [], []>} : vector<24x64xbf16>, vector<64x256xbf16>, vector<24x256xf32> -> vector<24x256xf32>
    %14 = vector.extract_strided_slice %13 {offsets = [0, 0], sizes = [24, 128], strides = [1, 1]} : vector<24x256xf32> to vector<24x128xf32>
    %15 = vector.extract_strided_slice %13 {offsets = [0, 128], sizes = [24, 128], strides = [1, 1]} : vector<24x256xf32> to vector<24x128xf32>
    %16 = arith.mulf %14, %14 : vector<24x128xf32>
    %17 = arith.mulf %15, %15 : vector<24x128xf32>
    %18 = arith.addf %16, %17 : vector<24x128xf32>
    %19 = math.sqrt %18 : vector<24x128xf32>
    %20 = arith.truncf %19 : vector<24x128xf32> to vector<24x128xbf16>
    %c0_7 = arith.constant 0 : index
    %c0_8 = arith.constant 0 : index
    %21 = vector.load %arg5[%c0_7, %c0_8] : memref<128x128xbf16, #tpu.memory_space<vmem>>, vector<128x128xbf16>
    %cst_9 = arith.constant dense<0.000000e+00> : vector<24x128xf32>
    %22 = tpu.matmul %20, %21, %cst_9 {dimension_numbers = #tpu.dot_dimension_numbers<[1], [0], [0], [1], [0, 0, 1, 1], [], []>} : vector<24x128xbf16>, vector<128x128xbf16>, vector<24x128xf32> -> vector<24x128xf32>
    %cst_10 = arith.constant 9.99999974E-6 : f32
    %23 = vector.broadcast %cst_10 : f32 to vector<24x128xf32>
    %24 = arith.maximumf %22, %23 : vector<24x128xf32>
    %25 = math.log %24 : vector<24x128xf32>
    %c0_11 = arith.constant 0 : index
    %c0_12 = arith.constant 0 : index
    %c0_13 = arith.constant 0 : index
    %26 = vector.load %arg6[%c0_11, %c0_12, %c0_13] : memref<1x24x128xf32, #tpu.memory_space<vmem>>, vector<1x24x128xf32>
    %27 = vector.shape_cast %26 : vector<1x24x128xf32> to vector<24x128xf32>
    %28 = vector.shape_cast %25 : vector<24x128xf32> to vector<1x24x128xf32>
    tpu.vector_store %arg6[%c0_11, %c0_12, %c0_13], %28 {strides = array<i32>} : memref<1x24x128xf32, #tpu.memory_space<vmem>>, vector<1x24x128xf32>,
    return
  }
  func.func @transform_0(%arg0: i32, %arg1: i32) -> (i32, i32, i32) {
    %c0_i32 = arith.constant 0 : i32
    %c0_i32_0 = arith.constant 0 : i32
    return %arg0, %arg1, %c0_i32 : i32, i32, i32
  }
  func.func @transform_1(%arg0: i32, %arg1: i32) -> (i32, i32, i32) {
    %c1_i32 = arith.constant 1 : i32
    %0 = arith.addi %arg1, %c1_i32 : i32
    %c0_i32 = arith.constant 0 : i32
    %c0_i32_0 = arith.constant 0 : i32
    return %arg0, %0, %c0_i32 : i32, i32, i32
  }
  func.func @transform_2(%arg0: i32, %arg1: i32) -> (i32, i32) {
    %c0_i32 = arith.constant 0 : i32
    %c0_i32_0 = arith.constant 0 : i32
    %c0_i32_1 = arith.constant 0 : i32
    return %c0_i32, %c0_i32_0 : i32, i32
  }
  func.func @transform_3(%arg0: i32, %arg1: i32) -> (i32, i32) {
    %c0_i32 = arith.constant 0 : i32
    %c0_i32_0 = arith.constant 0 : i32
    %c0_i32_1 = arith.constant 0 : i32
    return %c0_i32, %c0_i32_0 : i32, i32
  }
  func.func @transform_4(%arg0: i32, %arg1: i32) -> (i32, i32, i32) {
    %c0_i32 = arith.constant 0 : i32
    %c0_i32_0 = arith.constant 0 : i32
    return %arg0, %arg1, %c0_i32 : i32, i32, i32
  }
}

</mosaic_0001>

<bundles_post_ra>
// kernel: tpu_custom_call.1
= control target key start
LH: loop header
LB: loop body
LE: loop exit
PB: predicated region body
PF: predicated region fallthrough
CT: control target
= control target key end

     0   :  { %9 = vsyncpa [#allocation3], 0  ;;  %s1151_s0 = inlined_call_operand.vmem [shape: f32[2,48,16], index: 0, kind: input, shape index: {}]   ;;  %s1152_s1 = inlined_call_operand.vmem [shape: f32[2,48,16], index: 1, kind: input, shape index: {}]   ;;  %s1153_s2 = inlined_call_operand.vmem [shape: bf16[64,256], index: 2, kind: input, shape index: {}]   ;;  %s1154_s3 = inlined_call_operand.vmem [shape: bf16[128,128], index: 3, kind: input, shape index: {}]   ;;  %s1155_s4 = inlined_call_operand.hbm [shape: f32[2,24,128], index: 4, kind: output, shape index: {}]  }
   0x1   :  { %11 = vsyncpa [#allocation3 + $0x1], 0  ;;  %s984_s15 = smov 0   ;;  %s986_s16 = smov 0  }
   0x2   :  { %s988_s17 = smov 0   ;;  %s990_s18 = smov 0  }
   0x3   :  { %s992_s19 = smov 0   ;;  %s994_s20 = smov 0  }
   0x4 LB: > { %s714_s21 = sadd.s32 4294967295, %s950_s20   ;;  %s715_s22 = sadd.s32 4294967294, %s950_s20   ;;  %s950_s20 = sphi %s994_s20, %s17_s20   ;;  %s946_s19 = sphi %s992_s19, %s1162_s19   ;;  %s942_s18 = sphi %s990_s18, %s1161_s18   ;;  %s938_s17 = sphi %s988_s17, %s1160_s17   ;;  %s934_s16 = sphi %s986_s16, %s1159_s16   ;;  %s930_s15 = sphi %s984_s15, %s1158_s15  }
   0x5   : > { %s29_s23 = sadd.s32 1, %s946_s19  ;;  %s138_s24 = sadd.s32 1, %s938_s17 }
   0x6   : > { %p31_p0 = scmp.ge.s32.totalorder %s29_s23, 2  ;;  %p148_p1 = scmp.ne.s32.totalorder %s938_s17, %s934_s16 }
   0x7   : > { %p149_p2 = scmp.eq.s32.totalorder %s714_s21, 1  ;;  %p154_p3 = scmp.ne.s32.totalorder %s934_s16, %s930_s15 }
   0x8   : > { %s1164_s23 = smov (%p31_p0, %s29_s23), 0  ;;  %p155_p5 = scmp.eq.s32.totalorder %s715_s22, 1 }
   0x9   : > { %p1024_p4 = por %p149_p2, %p148_p1  ;;  %s133_s26 = ssub.s32 %s946_s19, %s1164_s23 }
   0xa   : > { %p718_p6 = scmp.ge.s32.totalorder %s950_s20, 1  ;;  %p136_p7 = scmp.eq.s32.totalorder %s133_s26, 0 }
   0xb   : > { %p1031_p8 = por %p155_p5, %p154_p3  ;;  %p207_p9 = scmp.lt.s32.totalorder %s950_s20, 3 }
   0xc   : > { %s1037_s28 = scalar_select %p136_p7, %s938_s17, %s138_s24  }
   0xd   : > { %p208_p10 = pnand %p718_p6, %p207_p9 }
   0xe   : > { %p248_p11 = scmp.lt.s32.totalorder (!%p208_p10), %s942_s18, 1  ;;  %v840_v0 = vld [vmem:[%s1153_s2 + $0x4] ss:$8 sps:$4 sm:$0xff] (!%p208_p10)   ;;  %v842_v1 = vld [vmem:[%s1153_s2] ss:$8 sps:$4 sm:$0xff] (!%p208_p10)   ;;  %vm281_vm1 = vcmask (!%p208_p10), 1043456  }
   0xf   : > { %211 = sbr.rel (%p208_p10) target bundleno = 647 (0x287), region = 36  ;;  %v843_v2 = vld [vmem:[%s1153_s2 + $0x14] ss:$8 sps:$4 sm:$0xff] (!%p208_p10)   ;;  %394 = vmatprep.subr.bf16.mxu0 (!%p208_p10), %v840_v0  ;;  %v845_v3 = vld [vmem:[%s1153_s2 + $0x10] ss:$8 sps:$4 sm:$0xff] (!%p208_p10)   ;;  %v952_v19 = vmov (!%p208_p10), 0  }
  0x10   : > { %395 = vmatpush1.bf16.msra.mxu0 (!%p208_p10), %v842_v1  ;;  %v846_v4 = vld [vmem:[%s1153_s2 + $0x24] ss:$8 sps:$4 sm:$0xff] (!%p208_p10)   ;;  %v848_v8 = vld [vmem:[%s1153_s2 + $0x20] ss:$8 sps:$4 sm:$0xff] (!%p208_p10)   ;;  %vm285_vm0 = vsmask.f32 (!%p208_p10), 7424  ;;  %426 = vmatprep.mubr.bf16.mxu0 (!%p208_p10), %v952_v19 }
  0x11   : > { %396 = vmatprep.subr.bf16.mxu0 (!%p208_p10), %v843_v2  ;;  %v849_v12 = vld [vmem:[%s1153_s2 + $0x34] ss:$8 sps:$4 sm:$0xff] (!%p208_p10)   ;;  %v851_v18 = vld [vmem:[%s1153_s2 + $0x30] ss:$8 sps:$4 sm:$0xff] (!%p208_p10)   ;;  %vm314_vm2 = vsmask.f32 (!%p208_p10), 6400 }
  0x12   : > { %vm306_vm3 = vcmask (!%p208_p10), 1046528   ;;  %s953_s12 = smov (!%p208_p10), 16   ;;  %v852_v37 = vld [vmem:[%s1154_s3] sm:$0xff] (!%p208_p10)   ;;  %vm326_vm4 = vcmask (!%p208_p10), 130048   ;;  %vm331_vm5 = vcmask (!%p208_p10), 261120   ;;  %vm336_vm6 = vcmask (!%p208_p10), 392192  }
  0x13   : > { %754 = vmatprep.subr.bf16.mxu1 (!%p208_p10), %v852_v37  ;;  %vm389_vm7 = vcmask (!%p208_p10), 523264   ;;  %v853_v51 = vld [vmem:[%s1154_s3 + $0x8] sm:$0xff] (!%p208_p10)   ;;  %v854_v52 = vld [vmem:[%s1154_s3 + $0x10] sm:$0xff] (!%p208_p10)   ;;  %v855_v53 = vld [vmem:[%s1154_s3 + $0x18] sm:$0xff] (!%p208_p10)   ;;  %s777_s30 = smul.u32 (!%p208_p10), 384, %s942_s18  ;;  %s956_s8 = smov (!%p208_p10), [#allocation2]  }
  0x14   : > { %397 = vmatpush1.bf16.msra.mxu0 (!%p208_p10), %v845_v3  ;;  %755 = vmatpush3.bf16.msra.mxu1 (!%p208_p10), %v852_v37  ;;  %v856_v54 = vld [vmem:[%s1154_s3 + $0x20] sm:$0xff] (!%p208_p10)   ;;  %v857_v55 = vld [vmem:[%s1154_s3 + $0x28] sm:$0xff] (!%p208_p10)   ;;  %v858_v56 = vld [vmem:[%s1154_s3 + $0x30] sm:$0xff] (!%p208_p10)   ;;  %s876_s9 = sshll.u32 (!%p208_p10), %s956_s8, 4  ;;  %s877_s9 = int_to_ptr.vmem [resolvable:$false] %s876_s9 }
  0x15   : > { %398 = vmatprep.subr.bf16.mxu0 (!%p208_p10), %v846_v4  ;;  %756 = vmatprep.subr.bf16.mxu1 (!%p208_p10), %v853_v51  ;;  %v859_v57 = vld [vmem:[%s1154_s3 + $0x38] sm:$0xff] (!%p208_p10)   ;;  %s1103_s6 = scalar_lea.hbm (!%p208_p10), %s1155_s4, %s777_s30 }
  0x16   : > { %s249_s29 = scalar_select %p248_p11, %s942_s18, 1 }
  0x18   : > { %s775_s10 = smul.u32 48, %s249_s29  ;;  %399 = vmatpush1.bf16.msra.mxu0 %v848_v8  ;;  %757 = vmatpush3.bf16.msra.mxu1 %v853_v51 }
  0x19   : > { %400 = vmatprep.subr.bf16.mxu0 %v849_v12  ;;  %758 = vmatprep.subr.bf16.mxu1 %v854_v52 }
  0x1a   : > { %s255_s21 = scalar_lea.vmem %s1151_s0, %s775_s10  ;;  %s743_s22 = sadd.s32 24, %s775_s10 }
  0x1b   : > { %s266_s29 = scalar_lea.vmem %s1152_s1, %s743_s22  ;;  %v271_v5 = vld [vmem:[%s255_s21] sm:$0xff]  ;;  %v272_v6 = vld [vmem:[%s255_s21 + $0x8] sm:$0xff]  ;;  %v273_v7 = vld [vmem:[%s255_s21 + $0x10] sm:$0xff]  ;;  %s954_s21 = smov 48  }
  0x1c   : > { %v274_v9 = vpack.c.bf16 %v272_v6, %v271_v5  ;;  %v276_v10 = vld [vmem:[%s266_s29] sm:$0xff]  ;;  %v277_v11 = vld [vmem:[%s266_s29 + $0x8] sm:$0xff]  ;;  %v275_v13 = vpack.c.bf16 %v273_v7, %v273_v7  ;;  %401 = vmatpush1.bf16.msra.mxu0 %v851_v18  ;;  %s955_s22 = smov 32   ;;  %759 = vmatpush3.bf16.msra.mxu1 %v854_v52  ;;  %s878_s10 = scalar_lea.vmem %s877_s9, 768 }
  0x1d   : > { %v278_v14 = vpack.c.bf16 %v277_v11, %v276_v10  ;;  %760 = vmatprep.subr.bf16.mxu1 %v855_v53 }
  0x1e   : > { %v287_v15 = vshrl.u32 %v274_v9, 16  ;;  %v289_v16 = vshll.u32 %v274_v9, 16  ;;  %v307_v28 = vrot.slane %v274_v9, 1 }
  0x1f   : > { %v280_v17 = vrot.slane %v278_v14, 4 }
  0x20   : > { %v291_v20 = vrot.slane %v289_v16, 1  ;;  %v315_v21 = vrot.slane %v287_v15, 1  ;;  %v316_v22 = vrot.slane %v289_v16, 2  ;;  %761 = vmatpush3.bf16.msra.mxu1 %v855_v53 }
  0x21   : > { %v284_v23 = vsel %vm281_vm1, %v275_v13, %v280_v17  ;;  %762 = vmatprep.subr.bf16.mxu1 %v856_v54 }
  0x22   : > { %v292_v24 = vor.u32 %v291_v20, %v287_v15  ;;  %v293_v25 = vshll.u32 %v284_v23, 16  ;;  %v297_v26 = vshrl.u32 %v284_v23, 16  ;;  %v317_v27 = vor.u32 %v316_v22, %v315_v21 }
  0x23   : > { %v308_v32 = vrot.slane %v284_v23, 1 }
  0x24   : > { %v295_v29 = vrot.slane %v293_v25, 1  ;;  %v318_v30 = vrot.slane %v297_v26, 1  ;;  %v319_v31 = vrot.slane %v293_v25, 2  ;;  %763 = vmatpush3.bf16.msra.mxu1 %v856_v54 }
  0x25   : > { %v309_v36 = vsel %vm306_vm3, %v307_v28, %v308_v32  ;;  %764 = vmatprep.subr.bf16.mxu1 %v857_v55 }
  0x26   : > { %v296_v33 = vsel %vm285_vm0, %v292_v24, %v295_v29  ;;  %v320_v34 = vor.u32 %v319_v31, %v318_v30  ;;  %v299_v38 = vor.u32 %v297_v26, %v295_v29 }
  0x27   : > { %300 = vrot.lane.b32.xlu0 %v296_v33, %s953_s12 }
  0x28   : > { %v321_v35 = vsel %vm314_vm2, %v317_v27, %v320_v34  ;;  %765 = vmatpush3.bf16.msra.mxu1 %v857_v55 }
  0x29   : > { %322 = vrot.lane.b32.xlu1 %v321_v35, %s954_s21  ;;  %766 = vmatprep.subr.bf16.mxu1 %v858_v56 }
  0x2b   : > { %310 = vrot.lane.b32.xlu0 %v309_v36, %s955_s22 }
  0x2c   : > { %767 = vmatpush3.bf16.msra.mxu1 %v858_v56 }
  0x2d   : > { %302 = vrot.lane.b32.xlu1 %v299_v38, %s953_s12  ;;  %768 = vmatprep.subr.bf16.mxu1 %v859_v57 }
  0x2f   : > { %312 = vrot.lane.b32.xlu0 %v308_v32, %s955_s22 }
  0x30   : > { %769 = vmatpush3.bf16.msra.mxu1 %v859_v57 }
  0x31   : > { %324 = vrot.lane.b32.xlu1 %v320_v34, %s954_s21  ;;  %s244_s21 = sand.u32 1, %s934_s16  }
  0x32   : > { %s774_s22 = smul.u32 24, %s244_s21  ;;  %s1105_s7 = scalar_lea.sflag [#allocation3], %s244_s21 }
  0x34   : > { %s246_s24 = scalar_lea.vmem [#allocation2], %s774_s22 }
  0x35   : > { %s617_s26 = sshll.u32 %s246_s24, 4  ;;  %s1098_s26 = int_to_ptr.vmem [resolvable:$true] %s617_s26 }
  0x36   : > { %s872_s18 = scalar_lea.vmem %s1098_s26, 384  ;;  %p879_p1 = scmp.lt.s32.totalorder %s1098_s26, %s877_s9 }
  0x37   : > { %p873_p12 = scmp.ne.s32.totalorder %s1098_s26, %s872_s18  ;;  %p880_p2 = scmp.lt.s32.totalorder %s878_s10, %s872_s18 }
  0x39   : > { %p874_p13 = pnand %p873_p12, %p1024_p4  ;;  %p881_p3 = por %p880_p2, %p879_p1 }
  0x3b   : > { %p875_p0 = pneg %p874_p13 }
  0x3d   : > { %p882_p5 = pnand %p881_p3, %p875_p0 }
  0x99   : > { %v301_v39 = vpop.permute.xlu0 %300 }
  0x9a   : > { %v328_v41 = vsel %vm326_vm4, %v274_v9, %v301_v39 }
  0x9b   : > { %v323_v40 = vpop.permute.xlu1 %322 }
  0x9d   : > { %v311_v42 = vpop.permute.xlu0 %310 }
  0x9e   : > { %v333_v43 = vsel %vm331_vm5, %v328_v41, %v311_v42 }
  0x9f   : > { %v303_v44 = vpop.permute.xlu1 %302  ;;  %v338_v45 = vsel %vm336_vm6, %v333_v43, %v323_v40 }
  0xa0   : > { %729 = vmatmul.mubr.msk.bf16.vlgmr.msra.gmra.mrb[0].mxu0 %vm389_vm7, %v338_v45  ;;  %v330_v46 = vsel %vm326_vm4, %v284_v23, %v303_v44 }
  0xa1   : > { %v313_v47 = vpop.permute.xlu0 %312  ;;  %436 = vmatprep.mubr.bf16.mxu0 %v952_v19 }
  0xa2   : > { %v335_v48 = vsel %vm331_vm5, %v330_v46, %v313_v47 }
  0xa3   : > { %v325_v49 = vpop.permute.xlu1 %324 }
  0xa4   : > { %v340_v50 = vsel %vm336_vm6, %v335_v48, %v325_v49 }
  0xa8   : > { %730 = vmatmul.mubr.msk.bf16.gmra.mrb[4].mxu0 %vm389_vm7, %v340_v50 }
 0x173   : > { %v428_v58 = vpop.f32.mrb[0].mxu0 }
 0x174   : > { %v445_v59 = vmul.f32 %v428_v58, %v428_v58  ;;  %v430_v60 = vpop.f32.mrb[1].mxu0 }
 0x175   : > { %v448_v61 = vmul.f32 %v430_v60, %v430_v60  ;;  %v432_v62 = vpop.f32.mrb[2].mxu0 }
 0x176   : > { %v446_v63 = vmul.f32 %v432_v62, %v432_v62  ;;  %v434_v0 = vpop.f32.mrb[3].mxu0 }
 0x177   : > { %v451_v1 = vadd.f32 %v448_v61, %v445_v59  ;;  %v449_v2 = vmul.f32 %v434_v0, %v434_v0 }
 0x179   : > { %v452_v3 = vadd.f32 %v449_v2, %v446_v63  ;;  %860 = vrsqrt.f32 %v451_v1  ;;  %vm456_vm8 = vcmp.eq.f32.partialorder %v451_v1, inf  ;;  %v459_v16 = vand.u32 2147483648, %v451_v1 }
 0x17a   : > { %vm458_vm10 = vcmp.eq.f32.partialorder %v451_v1, 0.0 }
 0x17b   : > { %v438_v4 = vpop.f32.mrb[4].mxu0  ;;  %862 = vrsqrt.f32 %v452_v3  ;;  %vm463_vm9 = vcmp.eq.f32.partialorder %v452_v3, inf  ;;  %v466_v17 = vand.u32 2147483648, %v452_v3  ;;  %vm465_vm11 = vcmp.eq.f32.partialorder %v452_v3, 0.0 }
 0x17c   : > { %v447_v5 = vmul.f32 %v438_v4, %v438_v4  ;;  %v440_v6 = vpop.f32.mrb[5].mxu0 }
 0x17d   : > { %v450_v7 = vmul.f32 %v440_v6, %v440_v6  ;;  %v442_v8 = vpop.f32.mrb[6].mxu0 }
 0x17e   : > { %v443_v9 = vpop.f32.mrb[7].mxu0 }
 0x17f   : > { %v453_v10 = vadd.f32 %v450_v7, %v447_v5 }
 0x181   : > { %864 = vrsqrt.f32 %v453_v10  ;;  %vm470_vm12 = vcmp.eq.f32.partialorder %v453_v10, inf  ;;  %v473_v24 = vand.u32 2147483648, %v453_v10  ;;  %vm472_vm13 = vcmp.eq.f32.partialorder %v453_v10, 0.0 }
 0x183   : > { %v861_v11 = vpop.eup %860 }
 0x184   : > { %v455_v12 = vmul.f32 %v861_v11, %v451_v1 }
 0x185   : > { %v863_v13 = vpop.eup %862 }
 0x186   : > { %v457_v14 = vsel %vm456_vm8, %v451_v1, %v455_v12  ;;  %v462_v15 = vmul.f32 %v863_v13, %v452_v3 }
 0x187   : > { %v460_v19 = vsel %vm458_vm10, %v459_v16, %v457_v14 }
 0x188   : > { %v464_v18 = vsel %vm463_vm9, %v452_v3, %v462_v15 }
 0x189   : > { %v467_v20 = vsel %vm465_vm11, %v466_v17, %v464_v18 }
 0x18a   : > { %v475_v21 = vpack.c.bf16 %v467_v20, %v460_v19 }
 0x18b   : > { %v865_v22 = vpop.eup %864 }
 0x18c   : > { %770 = vmatprep.mubr.bf16.mxu1 %v475_v21  ;;  %v469_v23 = vmul.f32 %v865_v22, %v453_v10 }
 0x18e   : > { %v471_v25 = vsel %vm470_vm12, %v453_v10, %v469_v23 }
 0x18f   : > { %v474_v26 = vsel %vm472_vm13, %v473_v24, %v471_v25 }
 0x190   : > { %v476_v27 = vpack.c.bf16 %v474_v26, %v474_v26 }
 0x192   : > { %771 = vmatmul.mubr.bf16.vlgmr.msra.gmra.mrb[0].mxu1 %v476_v27 }
 0x265   : > { %v772_v28 = vpop.f32.mrb[0].mxu1 }
 0x266   : > { %v591_v29 = vmax.f32 %v772_v28, 1e-05  ;;  %v575_v30 = vpop.f32.mrb[1].mxu1 }
 0x267   : > { %v589_v31 = vmax.f32 %v575_v30, 1e-05  ;;  %v773_v32 = vpop.f32.mrb[2].mxu1 }
 0x268   : > { %866 = vlog2.f32 %v591_v29  ;;  %v578_v33 = vpop.f32.mrb[3].mxu1 }
 0x269   : > { %868 = vlog2.f32 %v589_v31  ;;  %v590_v34 = vmax.f32 %v578_v33, 1e-05 }
 0x26b   : > { %870 = vlog2.f32 %v590_v34 }
 0x272   : > { %v867_v35 = vpop.eup %866 }
 0x273   : > { %v869_v36 = vpop.eup %868  ;;  %v597_v37 = vmul.f32 0.6931472, %v867_v35 }
 0x274   : > { %v593_v38 = vmul.f32 0.6931472, %v869_v36 }
 0x275   : > { %v871_v39 = vpop.eup %870  ;;  %600 = vst [vmem:[%s246_s24 + $0x10] sm:$0xff] %v597_v37 }
 0x276   : > { %598 = vst [vmem:[%s246_s24] sm:$0xff] %v593_v38  ;;  %v595_v40 = vmul.f32 0.6931472, %v871_v39 }
 0x278   : > { %599 = vst [vmem:[%s246_s24 + $0x8] sm:$0xff] %v595_v40 }
 0x279   : > { %885 = shalt.err (!%p882_p5)
}
 0x27a   : > { %s886_s11 = scalar_lea.hbm %s1103_s6, 384  ;;  %s890_s14 = scalar_lea.hbm %s1155_s4, 768 }
 0x27b   : > { %p887_p6 = scmp.ne.s32.totalorder %s1103_s6, %s886_s11  ;;  %p891_p10 = scmp.lt.u32.totalorder %s1103_s6, %s1155_s4 }
 0x27c   : > { %p892_p11 = scmp.lt.u32.totalorder %s890_s14, %s886_s11  ;;  %p894_p13 = scmp.lt.u32.totalorder %s886_s11, %s1103_s6 }
 0x27d   : > { %p888_p7 = pnand %p887_p6, %p1024_p4 }
 0x27e   : > { %p893_p12 = por %p892_p11, %p891_p10 }
 0x27f   : > { %p889_p9 = pneg %p888_p7 }
 0x280   : > { %p895_p0 = por %p894_p13, %p893_p12 }
 0x282   : > { %p896_p1 = pnand %p895_p0, %p889_p9 }
 0x284   : > { %899 = shalt.err (!%p896_p1)
}
 0x285   : > { %s957_s24 = smov 128   ;;  %s958_s30 = smov 8  }
 0x286   : > { %778 = dma.vmem_to_hbm [thread:$0]  (%p1024_p4), %s1098_s26, 384, %s1103_s6, %s1105_s7, %s957_s24, %s957_s24, %s958_s30  }
 0x287 PF: > { %p785_p2 = scmp.ge.s32.totalorder %s950_s20, 2  ;;  %s632_s5 = sand.u32 1, %s930_s15  }
 0x288   : > { %s633_s29 = scalar_lea.sflag [#allocation3], %s632_s5 }
 0x289   : > { %p781_p3 = pnand %p785_p2, %p1031_p8 }
 0x28b   : > { %925 = dma.done.wait (!%p781_p3), %s633_s29, 384  }
 0x28c   : > { %927 = vsyncadd (!%p781_p3), %s633_s29, 4294966912  ;;  %s17_s20 = sadd.s32 1, %s950_s20   ;;  %s1158_s15 = smov %s934_s16 }
 0x28d   : > { %p14_p5 = scmp.ge.s32.totalorder %s17_s20, 4   ;;  %s1159_s16 = smov %s938_s17 }
 0x28e   : > { %s1160_s17 = smov %s1037_s28  ;;  %s1161_s18 = smov %s946_s19 }
 0x28f   : > { %s1162_s19 = smov %s1164_s23  ;;  %16 = sbr.rel (!%p14_p5) target bundleno = 4 (0x4), region = 74 }
 0x296   :  { %638 = vsyncpa [#allocation3], 1 }
 0x297   :  { %640 = vsyncpa [#allocation3 + $0x1], 1 }

</bundles_post_ra>
